<compile_context>
chip_gen: v6e
topology: v6e:2x2x1
jax: 0.10.0
libtpu: 0.0.40
codegen_flags: <defaults>
</compile_context>

<pallas_src>
import math
import jax
import jax.numpy as jnp
import numpy as np
from jax import lax
from jax.experimental import pallas as pl
from jax.experimental.pallas import tpu as pltpu


def _round_up(x, m):
    return ((x + m - 1) // m) * m


# ----------------------------------------------------------------------------
# Head-(block-)major projection kernel:  out[b, blk, n, :] = x[b, n, :] @ Wt[:, blk] + b
# Optional fused row mask ("keep", 1.0 = keep, 0.0 = zero the projected row).
# ----------------------------------------------------------------------------
def _proj_hm_kernel(x_ref, w_ref, b_ref, o_ref):
    acc = jnp.dot(x_ref[0], w_ref[...], preferred_element_type=jnp.float32)
    o_ref[0, 0] = (acc + b_ref[...]).astype(o_ref.dtype)


def _proj_hm_masked_kernel(x_ref, w_ref, b_ref, keep_ref, o_ref):
    acc = jnp.dot(x_ref[0], w_ref[...], preferred_element_type=jnp.float32)
    o_ref[0, 0] = ((acc + b_ref[...]) * keep_ref[0]).astype(o_ref.dtype)


def proj_headmajor(x, w_t, b, *, n_blk, cols, keep=None, tn=512,
                   out_dtype=jnp.bfloat16):
    """x: (bs, n, d) -> (bs, n_blk, n_pad, cols);  w_t: (d, n_blk*cols)."""
    bs, n, d = x.shape
    assert w_t.shape == (d, n_blk * cols)
    tn = min(tn, _round_up(n, 8))
    n_pad = _round_up(n, tn)
    xb = x.astype(jnp.bfloat16)
    if n_pad != n:
        xb = jnp.pad(xb, ((0, 0), (0, n_pad - n), (0, 0)))

    args = [xb, w_t.astype(jnp.bfloat16),
            b.reshape(1, n_blk * cols).astype(jnp.float32)]
    in_specs = [
        pl.BlockSpec((1, tn, d), lambda b_, v_, h_: (b_, v_, 0)),
        pl.BlockSpec((d, cols), lambda b_, v_, h_: (0, h_)),
        pl.BlockSpec((1, cols), lambda b_, v_, h_: (0, h_)),
    ]
    kernel = _proj_hm_kernel
    if keep is not None:
        kp = keep.astype(jnp.float32)
        if n_pad != n:
            kp = jnp.pad(kp, ((0, 0), (0, n_pad - n), (0, 0)))
        args.append(kp)
        in_specs.append(pl.BlockSpec((1, tn, 1), lambda b_, v_, h_: (b_, v_, 0)))
        kernel = _proj_hm_masked_kernel

    return pl.pallas_call(
        kernel,
        out_shape=jax.ShapeDtypeStruct((bs, n_blk, n_pad, cols), out_dtype),
        grid=(bs, n_pad // tn, n_blk),            # blk innermost: x tile DMA reused
        in_specs=in_specs,
        out_specs=pl.BlockSpec((1, 1, tn, cols), lambda b_, v_, h_: (b_, h_, v_, 0)),
        compiler_params=pltpu.CompilerParams(
            dimension_semantics=("parallel", "parallel", "arbitrary")),
    )(*args)


# ----------------------------------------------------------------------------
# Fused output projection + bias + residual, consuming head-block-major input.
#   out[b, q, :] = sum_blk x[b, blk, q, :] @ Wt[blk*K:(blk+1)*K, :] + bias + identity
# ----------------------------------------------------------------------------
def _outproj_kernel(x_ref, w_ref, b_ref, idn_ref, o_ref):
    n_blk = x_ref.shape[1]
    k = x_ref.shape[3]
    acc = idn_ref[0] + b_ref[...]
    for j in range(n_blk):
        acc = acc + jnp.dot(x_ref[0, j], w_ref[j * k:(j + 1) * k, :],
                            preferred_element_type=jnp.float32)
    o_ref[0] = acc.astype(o_ref.dtype)


def outproj_residual_pallas(x_hm, w_t, b, identity, *, tq=128, out_dtype=jnp.float32):
    bs, n_hblk, nq_pad, hbdh = x_hm.shape
    d = w_t.shape[1]
    assert w_t.shape[0] == n_hblk * hbdh
    return pl.pallas_call(
        _outproj_kernel,
        out_shape=jax.ShapeDtypeStruct((bs, nq_pad, d), out_dtype),
        grid=(bs, nq_pad // tq),
        in_specs=[
            pl.BlockSpec((1, n_hblk, tq, hbdh), lambda b_, q_: (b_, 0, q_, 0)),
            pl.BlockSpec((n_hblk * hbdh, d), lambda b_, q_: (0, 0)),
            pl.BlockSpec((1, d), lambda b_, q_: (0, 0)),
            pl.BlockSpec((1, tq, d), lambda b_, q_: (b_, q_, 0)),
        ],
        out_specs=pl.BlockSpec((1, tq, d), lambda b_, q_: (b_, q_, 0)),
        compiler_params=pltpu.CompilerParams(
            dimension_semantics=("parallel", "parallel")),
    )(x_hm, w_t.astype(jnp.bfloat16), b.reshape(1, d).astype(jnp.float32),
      identity.astype(jnp.float32))


# ----------------------------------------------------------------------------
# Deformable-sampling kernel: per (batch, head-block, query-tile) grid cell.
# ----------------------------------------------------------------------------
def _make_deform_kernel(level_shapes, level_starts, level_hw_pad, L, P, Dh, HB, gp,
                        a_dtype):
    LP = L * P

    def kernel(qp_ref, ref_ref, value_ref, o_ref):
        # qp_ref   : (1, 1, tq, HB*gp) f32  per head h: [off_x LP | off_y LP | logits LP | pad]
        # ref_ref  : (1, tq, 2L) f32        per level l: (x, y) at lanes (2l, 2l+1)
        # value_ref: (1, 1, nv_pad, HB*Dh) bf16  (each level padded to a 128-multiple)
        # o_ref    : (1, 1, tq, HB*Dh)
        qp = qp_ref[0, 0]
        refpts = ref_ref[0]
        tq = qp.shape[0]

        # per-head softmax over all L*P attention logits (done once, reused per level)
        head_offx, head_offy, head_aw = [], [], []
        for h in range(HB):
            base = h * gp
            head_offx.append(qp[:, base:base + LP])
            head_offy.append(qp[:, base + LP:base + 2 * LP])
            head_aw.append(jax.nn.softmax(qp[:, base + 2 * LP:base + 3 * LP], axis=-1))

        accs = [jnp.zeros((tq, HB * Dh), jnp.float32) for _ in range(HB)]

        for l, (h_l, w_l) in enumerate(level_shapes):
            hwp = level_hw_pad[l]
            start = level_starts[l]
            v_l = value_ref[0, 0, start:start + hwp, :]          # (hwp, HB*Dh) bf16, aligned
            # hoisted once per level, shared by all heads
            col = lax.broadcasted_iota(jnp.int32, (tq, hwp), 1)
            rx = refpts[:, 2 * l:2 * l + 1]                      # (tq, 1)
            ry = refpts[:, 2 * l + 1:2 * l + 2]

            for h in range(HB):
                offx = head_offx[h][:, l * P:(l + 1) * P]        # (tq, P)
                offy = head_offy[h][:, l * P:(l + 1) * P]
                aw = head_aw[h][:, l * P:(l + 1) * P]

                # grid_sample(align_corners=False): pixel = loc*size - 0.5,
                # loc = ref + off/size  =>  pixel = ref*size + off - 0.5
                xp = rx * w_l + offx - 0.5
                yp = ry * h_l + offy - 0.5
                x0 = jnp.floor(xp)
                y0 = jnp.floor(yp)
                fx = xp - x0
                fy = yp - y0
                x0i = x0.astype(jnp.int32)
                y0i = y0.astype(jnp.int32)

                # one-hot accumulation matrix A (tq, hwp); bf16 accumulation
                A = jnp.zeros((tq, hwp), a_dtype)
                for dy in (0, 1):
                    cy = y0i + dy
                    wy = fy if dy else (1.0 - fy)
                    vy = (cy >= 0) & (cy <= h_l - 1)
                    cyc = jnp.clip(cy, 0, h_l - 1)
                    for dx in (0, 1):
                        cx = x0i + dx
                        wx = fx if dx else (1.0 - fx)
                        vx = (cx >= 0) & (cx <= w_l - 1)
                        cxc = jnp.clip(cx, 0, w_l - 1)
                        idx = cyc * w_l + cxc                                # (tq, P)
                        coef = jnp.where(vx & vy, wx * wy * aw, 0.0).astype(a_dtype)
                        for p in range(P):
                            A = A + jnp.where(col == idx[:, p:p + 1],
                                              coef[:, p:p + 1], 0.0)

                # full 128-lane value slab matmul; head band extracted after all levels
                accs[h] = accs[h] + jnp.dot(A, v_l, preferred_element_type=jnp.float32)

        out = jnp.concatenate([accs[h][:, h * Dh:(h + 1) * Dh] for h in range(HB)],
                              axis=-1)
        o_ref[0, 0] = out.astype(o_ref.dtype)

    return kernel


def deform_attn_pallas(qp, ref2, value_hm, spatial_shapes, level_starts, level_hw_pad,
                       L, P, Dh, HB, gp, *, tq=128, a_dtype=jnp.bfloat16,
                       out_dtype=jnp.bfloat16):
    """qp: (bs, n_hblk, nq_pad, HB*gp) f32; ref2: (bs, nq_pad, 2L) f32;
       value_hm: (bs, n_hblk, nv_pad, HB*Dh) bf16."""
    bs, n_hblk, nq_pad, hbgp = qp.shape
    _, _, nvp, hbdh = value_hm.shape
    assert hbdh == HB * Dh and hbgp == HB * gp and nq_pad % tq == 0

    kernel = _make_deform_kernel(tuple(spatial_shapes), tuple(level_starts),
                                 tuple(level_hw_pad), L, P, Dh, HB, gp, a_dtype)

    # rough VMEM budget; raise the scoped limit only when needed (default ~32 MiB)
    a_bytes = jnp.dtype(a_dtype).itemsize
    out_bytes = jnp.dtype(out_dtype).itemsize
    max_hwp = max(level_hw_pad)
    est = (2 * nvp * hbdh * 2 + 2 * tq * hbgp * 4 + 2 * tq * 2 * L * 4
           + 2 * tq * hbdh * out_bytes + HB * tq * hbdh * 4
           + 8 * tq * max_hwp * a_bytes + (2 << 20))
    cp_kwargs = dict(dimension_semantics=("parallel", "parallel", "parallel"))
    if est > (30 << 20):
        cp_kwargs["vmem_limit_bytes"] = int(min(est, 100 << 20))
    # TODO(synk): on v7x, pipeline_mode=pl.Buffered(1) on the value BlockSpec would drop
    #             the redundant second value buffer (its block index is constant along q).

    out = pl.pallas_call(
        kernel,
        out_shape=jax.ShapeDtypeStruct((bs, n_hblk, nq_pad, hbdh), out_dtype),
        grid=(bs, n_hblk, nq_pad // tq),
        in_specs=[
            pl.BlockSpec((1, 1, tq, hbgp), lambda b, h, q: (b, h, q, 0)),
            pl.BlockSpec((1, tq, 2 * L), lambda b, h, q: (b, q, 0)),
            pl.BlockSpec((1, 1, nvp, hbdh), lambda b, h, q: (b, h, 0, 0)),
        ],
        out_specs=pl.BlockSpec((1, 1, tq, hbdh), lambda b, h, q: (b, h, q, 0)),
        compiler_params=pltpu.CompilerParams(**cp_kwargs),
    )(qp, ref2, value_hm)
    return out


# ----------------------------------------------------------------------------
# Module (parameter setup + glue)
# ----------------------------------------------------------------------------
def _xavier_uniform(key, shape):
    fan_out, fan_in = shape
    a = math.sqrt(6.0 / (fan_in + fan_out))
    return jax.random.uniform(key, shape, jnp.float32, -a, a)


class MSDeformAttnPallas:
    def __init__(self, d_model=256, n_levels=4, n_heads=8, n_points=4, key=None,
                 tq=128, tnv=512):
        assert d_model % n_heads == 0
        self.d_model, self.n_levels, self.n_heads, self.n_points = \
            d_model, n_levels, n_heads, n_points
        self.d_head = d_model // n_heads
        self.tq, self.tnv = tq, tnv
        if key is None:
            key = jax.random.PRNGKey(0)
        k_v, k_o = jax.random.split(key, 2)
        H, L, P, Dh = n_heads, n_levels, n_points, self.d_head
        LP = L * P

        # --- reference-layout parameters (match torch _reset_parameters) ---
        self.W_off = jnp.zeros((H * L * P * 2, d_model), jnp.float32)
        thetas = jnp.arange(H, dtype=jnp.float32) * (2.0 * math.pi / H)
        grid_init = jnp.stack([jnp.cos(thetas), jnp.sin(thetas)], -1)
        grid_init = grid_init / jnp.max(jnp.abs(grid_init), axis=-1, keepdims=True)
        grid_init = jnp.tile(grid_init.reshape(H, 1, 1, 2), (1, L, P, 1))
        scale = jnp.arange(1, P + 1, dtype=jnp.float32).reshape(1, 1, P, 1)
        self.b_off = (grid_init * scale).reshape(-1)

        self.W_attn = jnp.zeros((H * L * P, d_model), jnp.float32)
        self.b_attn = jnp.zeros((H * L * P,), jnp.float32)

        self.W_val = _xavier_uniform(k_v, (d_model, d_model))
        self.b_val = jnp.zeros((d_model,), jnp.float32)
        self.W_out = _xavier_uniform(k_o, (d_model, d_model))
        self.b_out = jnp.zeros((d_model,), jnp.float32)

        # --- head blocking so the deform value/output slab is lane-dense ---
        if H * Dh <= 128:
            HB = H
        elif Dh <= 128 and 128 % Dh == 0 and H % (128 // Dh) == 0:
            HB = 128 // Dh
        else:
            HB = H
        self.HB = HB
        self.n_hblk = H // HB

        # per-head column group [x LP | y LP | attn LP | pad], padded so HB*gp % 128 == 0
        self.gp = _round_up(3 * LP, 128 // math.gcd(HB, 128))

        # fused, head-grouped sampling_offsets + attention_weights projection
        Wq = np.zeros((H * self.gp, d_model), np.float32)
        bq = np.zeros((H * self.gp,), np.float32)
        W_off = np.asarray(self.W_off); b_off = np.asarray(self.b_off)
        W_att = np.asarray(self.W_attn); b_att = np.asarray(self.b_attn)
        for h in range(H):
            for l in range(L):
                for p in range(P):
                    lp = l * P + p
                    src = (h * L + l) * P + p
                    Wq[h * self.gp + lp] = W_off[2 * src + 0]
                    bq[h * self.gp + lp] = b_off[2 * src + 0]
                    Wq[h * self.gp + LP + lp] = W_off[2 * src + 1]
                    bq[h * self.gp + LP + lp] = b_off[2 * src + 1]
                    Wq[h * self.gp + 2 * LP + lp] = W_att[src]
                    bq[h * self.gp + 2 * LP + lp] = b_att[src]
        self.W_q_hm_T = jnp.asarray(Wq).T          # (d, H*gp)
        self.b_q_hm = jnp.asarray(bq)
        self.W_val_T = self.W_val.T                # channels already head-major
        self.W_out_T = self.W_out.T

    def __call__(self, query, key=None, value=None, identity=None, query_pos=None,
                 key_padding_mask=None, reference_points=None, spatial_shapes=None,
                 level_start_index=None, flag='decoder', **kwargs):
        bs, nq, _ = query.shape
        _, nv, _ = value.shape
        spatial_shapes = tuple((int(h_), int(w_)) for h_, w_ in spatial_shapes)
        assert sum(h_ * w_ for h_, w_ in spatial_shapes) == nv
        H, L, P, Dh, d = self.n_heads, self.n_levels, self.n_points, self.d_head, self.d_model
        HB, n_hblk, gp = self.HB, self.n_hblk, self.gp
        assert reference_points.shape[-1] == 2  # TODO(synk): 4-/8-dim reference-box branches not implemented

        tq = min(self.tq, _round_up(nq, 8))
        nq_pad = _round_up(nq, tq)

        # --- per-level 128-padded value layout (aligned slices in the deform kernel) ---
        level_hw = [h_ * w_ for h_, w_ in spatial_shapes]
        level_hw_pad = [_round_up(hw, 128) for hw in level_hw]
        level_starts = list(np.cumsum([0] + level_hw_pad[:-1]))
        segs, keep_segs = [], []
        off = 0
        for l, hw in enumerate(level_hw):
            hwp = level_hw_pad[l]
            seg = value[:, off:off + hw]
            if key_padding_mask is not None:
                kp = 1.0 - key_padding_mask[:, off:off + hw].astype(jnp.float32)
            if hwp != hw:
                seg = jnp.pad(seg, ((0, 0), (0, hwp - hw), (0, 0)))
                if key_padding_mask is not None:
                    kp = jnp.pad(kp, ((0, 0), (0, hwp - hw)))
            segs.append(seg)
            if key_padding_mask is not None:
                keep_segs.append(kp)
            off += hw
        value_lp = jnp.concatenate(segs, axis=1) if len(segs) > 1 else segs[0]
        keep_lp = None
        if key_padding_mask is not None:
            keep_lp = (jnp.concatenate(keep_segs, axis=1)
                       if len(keep_segs) > 1 else keep_segs[0])[..., None]

        # value projection (mask fused), emitted head-block-major in bf16
        v_hm = proj_headmajor(value_lp, self.W_val_T, self.b_val, n_blk=n_hblk,
                              cols=HB * Dh, keep=keep_lp, tn=self.tnv,
                              out_dtype=jnp.bfloat16)

        # fused sampling_offsets + attention_weights projection, head-block-major, f32
        q_pad = query if nq_pad == nq else jnp.pad(query, ((0, 0), (0, nq_pad - nq), (0, 0)))
        qp = proj_headmajor(q_pad, self.W_q_hm_T, self.b_q_hm, n_blk=n_hblk,
                            cols=HB * gp, keep=None, tn=tq, out_dtype=jnp.float32)

        ref2 = reference_points.reshape(bs, nq, L * 2).astype(jnp.float32)
        if nq_pad != nq:
            ref2 = jnp.pad(ref2, ((0, 0), (0, nq_pad - nq), (0, 0)))

        out_hm = deform_attn_pallas(qp, ref2, v_hm, spatial_shapes, level_starts,
                                    level_hw_pad, L, P, Dh, HB, gp, tq=tq)

        if identity is None:
            identity = query
        idn = identity if nq_pad == nq else jnp.pad(identity, ((0, 0), (0, nq_pad - nq), (0, 0)))
        out = outproj_residual_pallas(out_hm, self.W_out_T, self.b_out, idn, tq=tq)
        # TODO(synk): self.dropout / self.batch_first are undefined attributes in the reference
        # module's __init__; treated as identity dropout and batch_first=True.
        return out[:, :nq] if nq_pad != nq else out

    # Pure-JAX reference (for validation only)
    def reference_forward(self, query, value, reference_points, spatial_shapes,
                          identity=None, key_padding_mask=None):
        bs, nq, _ = query.shape
        _, nv, _ = value.shape
        H, L, P, Dh, d = self.n_heads, self.n_levels, self.n_points, self.d_head, self.d_model
        hp = jax.lax.Precision.HIGHEST
        v = jnp.dot(value, self.W_val.T, precision=hp) + self.b_val
        if key_padding_mask is not None:
            v = jnp.where(key_padding_mask[..., None], 0.0, v)
        v = v.reshape(bs, nv, H, Dh)
        off = (jnp.dot(query, self.W_off.T, precision=hp) + self.b_off).reshape(bs, nq, H, L, P, 2)
        aw = (jnp.dot(query, self.W_attn.T, precision=hp) + self.b_attn).reshape(bs, nq, H, L * P)
        aw = jax.nn.softmax(aw, axis=-1).reshape(bs, nq, H, L, P)
        offset_normalizer = jnp.array([[w_, h_] for (h_, w_) in spatial_shapes], jnp.float32)
        loc = reference_points[:, :, None, :, None, :] + \
            off / offset_normalizer[None, None, None, :, None, :]
        out = jnp.zeros((bs, nq, H, Dh), jnp.float32)
        b_idx = jnp.arange(bs)[:, None, None, None]
        h_idx = jnp.arange(H)[None, None, :, None]
        start = 0
        for l, (H_, W_) in enumerate(spatial_shapes):
            v_l = v[:, start:start + H_ * W_].reshape(bs, H_, W_, H, Dh)
            start += H_ * W_
            lx = loc[:, :, :, l, :, 0]
            ly = loc[:, :, :, l, :, 1]
            xp = lx * W_ - 0.5
            yp = ly * H_ - 0.5
            x0 = jnp.floor(xp).astype(jnp.int32)
            y0 = jnp.floor(yp).astype(jnp.int32)
            fx = xp - x0
            fy = yp - y0
            samp = jnp.zeros((bs, nq, H, P, Dh), jnp.float32)
            for dy in (0, 1):
                for dx in (0, 1):
                    cx = x0 + dx
                    cy = y0 + dy
                    w = (fx if dx else 1.0 - fx) * (fy if dy else 1.0 - fy)
                    valid = (cx >= 0) & (cx < W_) & (cy >= 0) & (cy < H_)
                    cxc = jnp.clip(cx, 0, W_ - 1)
                    cyc = jnp.clip(cy, 0, H_ - 1)
                    g = v_l[b_idx, cyc, cxc, h_idx, :]
                    samp = samp + jnp.where(valid, w, 0.0)[..., None] * g
            out = out + jnp.sum(aw[:, :, :, l][..., None] * samp, axis=3)
        out = out.reshape(bs, nq, d)
        out = jnp.dot(out, self.W_out.T, precision=hp) + self.b_out
        if identity is None:
            identity = query
        return out + identity


# ----------------------------------------------------------------------------
if __name__ == "__main__":
    key = jax.random.PRNGKey(0)
    d_model, n_levels, n_heads, n_points = 32, 4, 8, 4
    bs, nq = 2, 8
    spatial_shapes = ((8, 8), (4, 4), (2, 2), (1, 1))   # (h, w) per level
    nv = sum(h * w for h, w in spatial_shapes)          # 85

    k1, k2, k3, k4, kp = jax.random.split(key, 5)
    query = jax.random.normal(k1, (bs, nq, d_model), jnp.float32)
    value = jax.random.normal(k2, (bs, nv, d_model), jnp.float32)
    reference_points = jax.random.uniform(k3, (bs, nq, n_levels, 2), jnp.float32)
    key_padding_mask = jax.random.bernoulli(k4, 0.2, (bs, nv))

    attn = MSDeformAttnPallas(d_model, n_levels, n_heads, n_points, key=kp)

    # no-mask path
    out = attn(query, value=value, reference_points=reference_points,
               spatial_shapes=spatial_shapes)
    out = jax.block_until_ready(out)
    assert out.shape == (bs, nq, d_model)
    assert bool(jnp.all(jnp.isfinite(out)))
    ref = attn.reference_forward(query, value, reference_points, spatial_shapes)
    np.testing.assert_allclose(np.asarray(out), np.asarray(ref), rtol=2e-2, atol=2e-2)

    # fused key_padding_mask path
    out_m = attn(query, value=value, reference_points=reference_points,
                 spatial_shapes=spatial_shapes, key_padding_mask=key_padding_mask)
    out_m = jax.block_until_ready(out_m)
    ref_m = attn.reference_forward(query, value, reference_points, spatial_shapes,
                                   key_padding_mask=key_padding_mask)
    np.testing.assert_allclose(np.asarray(out_m), np.asarray(ref_m), rtol=2e-2, atol=2e-2)

    print("KERNEL_OK")
</pallas_src>

<mosaic_0001>
module attributes {stable_mosaic.version = 11 : i64} {
  func.func @_proj_hm_kernel(%arg0: i32, %arg1: i32, %arg2: i32, %arg3: memref<1x512x32xbf16, #tpu.memory_space<vmem>>, %arg4: memref<32x32xbf16, #tpu.memory_space<vmem>>, %arg5: memref<1x32xf32, #tpu.memory_space<vmem>>, %arg6: memref<1x1x512x32xbf16, #tpu.memory_space<vmem>>) attributes {dimension_semantics = [#tpu.dimension_semantics<parallel>, #tpu.dimension_semantics<parallel>, #tpu.dimension_semantics<arbitrary>], iteration_bounds = array<i64: 2, 1, 1>, scalar_prefetch = 0 : i64, scratch_operands = 0 : i64, tpu.core_type = #tpu.core_type<tc>, window_params = [{transform_indices = @transform_0, window_bounds = array<i64: 1, 512, 32>}, {transform_indices = @transform_1, window_bounds = array<i64: 32, 32>}, {transform_indices = @transform_2, window_bounds = array<i64: 1, 32>}, {transform_indices = @transform_3, window_bounds = array<i64: 1, 1, 512, 32>}]} {
    %c0 = arith.constant 0 : index
    %c0_0 = arith.constant 0 : index
    %c0_1 = arith.constant 0 : index
    %0 = vector.load %arg3[%c0, %c0_0, %c0_1] : memref<1x512x32xbf16, #tpu.memory_space<vmem>>, vector<1x512x32xbf16>
    %1 = vector.shape_cast %0 : vector<1x512x32xbf16> to vector<512x32xbf16>
    %c0_2 = arith.constant 0 : index
    %c0_3 = arith.constant 0 : index
    %2 = vector.load %arg4[%c0_2, %c0_3] : memref<32x32xbf16, #tpu.memory_space<vmem>>, vector<32x32xbf16>
    %cst = arith.constant dense<0.000000e+00> : vector<512x32xf32>
    %3 = tpu.matmul %1, %2, %cst {dimension_numbers = #tpu.dot_dimension_numbers<[1], [0], [0], [1], [0, 0, 1, 1], [], []>} : vector<512x32xbf16>, vector<32x32xbf16>, vector<512x32xf32> -> vector<512x32xf32>
    %c0_4 = arith.constant 0 : index
    %c0_5 = arith.constant 0 : index
    %4 = vector.load %arg5[%c0_4, %c0_5] : memref<1x32xf32, #tpu.memory_space<vmem>>, vector<1x32xf32>
    %5 = vector.broadcast %4 : vector<1x32xf32> to vector<512x32xf32>
    %6 = arith.addf %3, %5 : vector<512x32xf32>
    %7 = arith.truncf %6 : vector<512x32xf32> to vector<512x32xbf16>
    %c0_6 = arith.constant 0 : index
    %c0_7 = arith.constant 0 : index
    %c0_8 = arith.constant 0 : index
    %c0_9 = arith.constant 0 : index
    %8 = vector.load %arg6[%c0_6, %c0_7, %c0_8, %c0_9] : memref<1x1x512x32xbf16, #tpu.memory_space<vmem>>, vector<1x1x512x32xbf16>
    %9 = vector.shape_cast %8 : vector<1x1x512x32xbf16> to vector<512x32xbf16>
    %10 = vector.shape_cast %7 : vector<512x32xbf16> to vector<1x1x512x32xbf16>
    tpu.vector_store %arg6[%c0_6, %c0_7, %c0_8, %c0_9], %10 {strides = array<i32>} : memref<1x1x512x32xbf16, #tpu.memory_space<vmem>>, vector<1x1x512x32xbf16>,
    return
  }
  func.func @transform_0(%arg0: i32, %arg1: i32, %arg2: i32) -> (i32, i32, i32) {
    %c0_i32 = arith.constant 0 : i32
    %c0_i32_0 = arith.constant 0 : i32
    return %arg0, %arg1, %c0_i32 : i32, i32, i32
  }
  func.func @transform_1(%arg0: i32, %arg1: i32, %arg2: i32) -> (i32, i32) {
    %c0_i32 = arith.constant 0 : i32
    %c0_i32_0 = arith.constant 0 : i32
    return %c0_i32, %arg2 : i32, i32
  }
  func.func @transform_2(%arg0: i32, %arg1: i32, %arg2: i32) -> (i32, i32) {
    %c0_i32 = arith.constant 0 : i32
    %c0_i32_0 = arith.constant 0 : i32
    return %c0_i32, %arg2 : i32, i32
  }
  func.func @transform_3(%arg0: i32, %arg1: i32, %arg2: i32) -> (i32, i32, i32, i32) {
    %c0_i32 = arith.constant 0 : i32
    %c0_i32_0 = arith.constant 0 : i32
    return %arg0, %arg2, %arg1, %c0_i32 : i32, i32, i32, i32
  }
}

</mosaic_0001>

<bundles_post_ra>
// kernel: tpu_custom_call.1
= control target key start
LH: loop header
LB: loop body
LE: loop exit
PB: predicated region body
PF: predicated region fallthrough
CT: control target
= control target key end

     0   :  { %s1764_s12 = smov 0   ;;  %s1766_s13 = smov 0   ;;  %s2075_s0 = inlined_call_operand.vmem [shape: bf16[2,512,32], index: 0, kind: input, shape index: {}]   ;;  %s2076_s1 = inlined_call_operand.vmem [shape: bf16[32,32], index: 1, kind: input, shape index: {}]   ;;  %s2077_s2 = inlined_call_operand.vmem [shape: f32[1,32], index: 2, kind: input, shape index: {}]   ;;  %s2078_s3 = inlined_call_operand.vmem [shape: bf16[2,1,512,32], index: 3, kind: output, shape index: {}]  }
   0x1   :  { %s1768_s14 = smov 0  }
   0x2 LB: > { %s32_s15 = sadd.s32 1, %s1738_s13  ;;  %p1352_p0 = scmp.ge.s32.totalorder %s1742_s14, 1  ;;  %s1742_s14 = sphi %s1768_s14, %s13_s14   ;;  %s1738_s13 = sphi %s1766_s13, %s2080_s13   ;;  %s1734_s12 = sphi %s1764_s12, %s2079_s12  }
   0x3   : > { %p34_p1 = scmp.ge.s32.totalorder %s32_s15, 2  ;;  %p184_p2 = scmp.lt.s32.totalorder %s1742_s14, 3 }
   0x5   : > { %s2082_s15 = smov (%p34_p1, %s32_s15), 0  ;;  %p185_p3 = pnand %p1352_p0, %p184_p2 }
   0x6   : > { %p228_p4 = scmp.lt.s32.totalorder (!%p185_p3), %s1734_s12, 1 }
   0x7   : > { %188 = sbr.rel (%p185_p3) target bundleno = 281 (0x119), region = 32 }
   0xc   : > { %v1686_v0 = vld [vmem:[%s2076_s1 + $0x8] sm:$0xff]   ;;  %v1687_v1 = vld [vmem:[%s2076_s1] sm:$0xff]   ;;  %s2084_s12 = smov (!%p228_p4, %s1734_s12), 1  ;;  %vm506_vm0 = vcmask 261120   ;;  %vm1148_vm1 = vcmask 257024  }
   0xd   : > { %1590 = vmatprep.subr.bf16.mxu0 %v1686_v0  ;;  %1658 = vmatprep.subr.bf16.mxu1 %v1686_v0  ;;  %s1490_s20 = sshll.u32 %s2084_s12, 8  ;;  %v1865_v34 = vld [vmem:[%s2077_s2] ss:$0 sm:$0xff] }
   0xe   : > { %1591 = vmatpush3.bf16.msra.mxu0 %v1686_v0  ;;  %1660 = vmatpush3.bf16.msra.mxu1 %v1686_v0  ;;  %s1796_s23 = scalar_lea.vmem %s2075_s0, %s1490_s20  ;;  %s1873_s28 = scalar_lea.vmem %s2078_s3, %s1490_s20 }
   0xf   : > { %1592 = vmatprep.subr.bf16.mxu0 %v1687_v1  ;;  %1659 = vmatprep.subr.bf16.mxu1 %v1687_v1  ;;  %v1688_v2 = vld [vmem:[%s1796_s23] sm:$0xff]   ;;  %v1690_v4 = vld [vmem:[%s1796_s23 + $0x8] sm:$0xff]   ;;  %v1692_v6 = vld [vmem:[%s1796_s23 + $0x10] sm:$0xff]  }
  0x10   : > { %v1689_v3 = vld [vmem:[%s1796_s23 + $0x80] sm:$0xff]   ;;  %1594 = vmatprep.mubr.msk.bf16.mxu0 %vm506_vm0, %v1688_v2  ;;  %v1691_v5 = vld [vmem:[%s1796_s23 + $0x88] sm:$0xff]   ;;  %v1693_v7 = vld [vmem:[%s1796_s23 + $0x90] sm:$0xff]  }
  0x11   : > { %1626 = vmatprep.mubr.msk.bf16.mxu1 %vm506_vm0, %v1689_v3  ;;  %v1694_v8 = vld [vmem:[%s1796_s23 + $0x18] sm:$0xff]   ;;  %v1696_v10 = vld [vmem:[%s1796_s23 + $0x20] sm:$0xff]   ;;  %v1698_v12 = vld [vmem:[%s1796_s23 + $0x28] sm:$0xff]  }
  0x12   : > { %1593 = vmatpush3.bf16.msra.mxu0 %v1687_v1  ;;  %1661 = vmatpush3.bf16.msra.mxu1 %v1687_v1  ;;  %v1695_v9 = vld [vmem:[%s1796_s23 + $0x98] sm:$0xff]   ;;  %v1697_v11 = vld [vmem:[%s1796_s23 + $0xa0] sm:$0xff]   ;;  %v1699_v13 = vld [vmem:[%s1796_s23 + $0xa8] sm:$0xff]  }
  0x13   : > { %v1700_v14 = vld [vmem:[%s1796_s23 + $0x30] sm:$0xff]   ;;  %v1702_v16 = vld [vmem:[%s1796_s23 + $0x38] sm:$0xff]   ;;  %v1704_v18 = vld [vmem:[%s1796_s23 + $0x40] sm:$0xff]  }
  0x14   : > { %v1701_v15 = vld [vmem:[%s1796_s23 + $0xb0] sm:$0xff]   ;;  %v1703_v17 = vld [vmem:[%s1796_s23 + $0xb8] sm:$0xff]   ;;  %v1705_v19 = vld [vmem:[%s1796_s23 + $0xc0] sm:$0xff]  }
  0x15   : > { %1595 = vmatmul.mubr.msk.bf16.vlgmr.msra.gmra.mxu0 %vm506_vm0, %v1690_v4  ;;  %1627 = vmatmul.mubr.msk.bf16.vlgmr.msra.gmra.mxu1 %vm506_vm0, %v1691_v5  ;;  %v1706_v20 = vld [vmem:[%s1796_s23 + $0x48] sm:$0xff]   ;;  %v1708_v22 = vld [vmem:[%s1796_s23 + $0x50] sm:$0xff]   ;;  %v1710_v24 = vld [vmem:[%s1796_s23 + $0x58] sm:$0xff]  }
  0x16   : > { %1598 = vmatprep.mubr.msk.bf16.mxu0 %vm506_vm0, %v1692_v6  ;;  %1630 = vmatprep.mubr.msk.bf16.mxu1 %vm506_vm0, %v1693_v7  ;;  %v1707_v21 = vld [vmem:[%s1796_s23 + $0xc8] sm:$0xff]   ;;  %v1709_v23 = vld [vmem:[%s1796_s23 + $0xd0] sm:$0xff]   ;;  %v1711_v25 = vld [vmem:[%s1796_s23 + $0xd8] sm:$0xff]  }
  0x17   : > { %v1712_v26 = vld [vmem:[%s1796_s23 + $0x60] sm:$0xff]   ;;  %v1714_v28 = vld [vmem:[%s1796_s23 + $0x68] sm:$0xff]   ;;  %v1716_v30 = vld [vmem:[%s1796_s23 + $0x70] sm:$0xff]  }
  0x18   : > { %v1713_v27 = vld [vmem:[%s1796_s23 + $0xe0] sm:$0xff]   ;;  %v1715_v29 = vld [vmem:[%s1796_s23 + $0xe8] sm:$0xff]   ;;  %v1717_v31 = vld [vmem:[%s1796_s23 + $0xf0] sm:$0xff]  }
  0x19   : > { %v1718_v32 = vld [vmem:[%s1796_s23 + $0x78] sm:$0xff]  }
  0x1a   : > { %v1719_v33 = vld [vmem:[%s1796_s23 + $0xf8] sm:$0xff]  }
  0x1d   : > { %1599 = vmatmul.mubr.msk.bf16.gmra.mxu0 %vm506_vm0, %v1694_v8  ;;  %1631 = vmatmul.mubr.msk.bf16.gmra.mxu1 %vm506_vm0, %v1695_v9 }
  0x1e   : > { %1602 = vmatprep.mubr.msk.bf16.mxu0 %vm506_vm0, %v1696_v10  ;;  %1634 = vmatprep.mubr.msk.bf16.mxu1 %vm506_vm0, %v1697_v11 }
  0x25   : > { %1603 = vmatmul.mubr.msk.bf16.gmra.mxu0 %vm506_vm0, %v1698_v12  ;;  %1635 = vmatmul.mubr.msk.bf16.gmra.mxu1 %vm506_vm0, %v1699_v13 }
  0x26   : > { %1606 = vmatprep.mubr.msk.bf16.mxu0 %vm506_vm0, %v1700_v14  ;;  %1638 = vmatprep.mubr.msk.bf16.mxu1 %vm506_vm0, %v1701_v15 }
  0x2d   : > { %1607 = vmatmul.mubr.msk.bf16.gmra.mxu0 %vm506_vm0, %v1702_v16  ;;  %1639 = vmatmul.mubr.msk.bf16.gmra.mxu1 %vm506_vm0, %v1703_v17 }
  0x2e   : > { %1610 = vmatprep.mubr.msk.bf16.mxu0 %vm506_vm0, %v1704_v18  ;;  %1642 = vmatprep.mubr.msk.bf16.mxu1 %vm506_vm0, %v1705_v19 }
  0x35   : > { %1611 = vmatmul.mubr.msk.bf16.gmra.mxu0 %vm506_vm0, %v1706_v20  ;;  %1643 = vmatmul.mubr.msk.bf16.gmra.mxu1 %vm506_vm0, %v1707_v21 }
  0x36   : > { %1614 = vmatprep.mubr.msk.bf16.mxu0 %vm506_vm0, %v1708_v22  ;;  %1646 = vmatprep.mubr.msk.bf16.mxu1 %vm506_vm0, %v1709_v23 }
  0x3d   : > { %1615 = vmatmul.mubr.msk.bf16.gmra.mxu0 %vm506_vm0, %v1710_v24  ;;  %1647 = vmatmul.mubr.msk.bf16.gmra.mxu1 %vm506_vm0, %v1711_v25 }
  0x3e   : > { %1618 = vmatprep.mubr.msk.bf16.mxu0 %vm506_vm0, %v1712_v26  ;;  %1650 = vmatprep.mubr.msk.bf16.mxu1 %vm506_vm0, %v1713_v27 }
  0x45   : > { %1619 = vmatmul.mubr.msk.bf16.gmra.mxu0 %vm506_vm0, %v1714_v28  ;;  %1651 = vmatmul.mubr.msk.bf16.gmra.mxu1 %vm506_vm0, %v1715_v29 }
  0x46   : > { %1622 = vmatprep.mubr.msk.bf16.mxu0 %vm506_vm0, %v1716_v30  ;;  %1654 = vmatprep.mubr.msk.bf16.mxu1 %vm506_vm0, %v1717_v31 }
  0x4d   : > { %1623 = vmatmul.mubr.msk.bf16.gmra.mxu0 %vm506_vm0, %v1718_v32  ;;  %1655 = vmatmul.mubr.msk.bf16.gmra.mxu1 %vm506_vm0, %v1719_v33 }
  0xd5   : > { %v1596_v35 = vpop.f32.mrf.mxu0  ;;  %v1628_v37 = vpop.f32.mrf.mxu1 }
  0xd6   : > { %v646_v36 = vadd.f32 %v1596_v35, %v1865_v34  ;;  %v774_v38 = vadd.f32 %v1628_v37, %v1865_v34 }
  0xd7   : > { %v637_v39 = vpop.f32.mrf.mxu0  ;;  %v765_v42 = vpop.f32.mrf.mxu1 }
  0xd8   : > { %v1494_v40 = vpack.c.bf16 %v646_v36, %v646_v36  ;;  %v638_v41 = vadd.f32 %v1865_v34, %v637_v39  ;;  %v1526_v43 = vpack.c.bf16 %v774_v38, %v774_v38  ;;  %v766_v44 = vadd.f32 %v1865_v34, %v765_v42 }
  0xd9   : > { %v1597_v45 = vpop.f32.mrf.mxu0  ;;  %v1629_v48 = vpop.f32.mrf.mxu1 }
  0xda   : > { %1151 = vst.msk [vmem:[%s1873_s28 + $0x8] sm:$0xf] %vm1148_vm1, %v1494_v40  ;;  %v1492_v46 = vpack.c.bf16 %v638_v41, %v638_v41  ;;  %v649_v47 = vadd.f32 %v1597_v45, %v1865_v34  ;;  %1183 = vst.msk [vmem:[%s1873_s28 + $0x88] sm:$0xf] %vm1148_vm1, %v1526_v43  ;;  %v1524_v49 = vpack.c.bf16 %v766_v44, %v766_v44 }
  0xdb   : > { %v777_v50 = vadd.f32 %v1629_v48, %v1865_v34  ;;  %v640_v51 = vpop.f32.mrf.mxu0  ;;  %v768_v54 = vpop.f32.mrf.mxu1 }
  0xdc   : > { %1149 = vst.msk [vmem:[%s1873_s28] sm:$0xf] %vm1148_vm1, %v1492_v46  ;;  %v1495_v52 = vpack.c.bf16 %v649_v47, %v649_v47  ;;  %v641_v53 = vadd.f32 %v1865_v34, %v640_v51  ;;  %1181 = vst.msk [vmem:[%s1873_s28 + $0x80] sm:$0xf] %vm1148_vm1, %v1524_v49  ;;  %v769_v56 = vadd.f32 %v1865_v34, %v768_v54 }
  0xdd   : > { %v1527_v55 = vpack.c.bf16 %v777_v50, %v777_v50  ;;  %v1600_v57 = vpop.f32.mrf.mxu0  ;;  %v1632_v60 = vpop.f32.mrf.mxu1 }
  0xde   : > { %1152 = vst.msk [vmem:[%s1873_s28 + $0xc] sm:$0xf] %vm1148_vm1, %v1495_v52  ;;  %v1493_v58 = vpack.c.bf16 %v641_v53, %v641_v53  ;;  %v662_v59 = vadd.f32 %v1600_v57, %v1865_v34  ;;  %v1525_v61 = vpack.c.bf16 %v769_v56, %v769_v56  ;;  %v790_v62 = vadd.f32 %v1632_v60, %v1865_v34 }
  0xdf   : > { %1184 = vst.msk [vmem:[%s1873_s28 + $0x8c] sm:$0xf] %vm1148_vm1, %v1527_v55  ;;  %v653_v63 = vpop.f32.mrf.mxu0  ;;  %v781_v2 = vpop.f32.mrf.mxu1 }
  0xe0   : > { %1150 = vst.msk [vmem:[%s1873_s28 + $0x4] sm:$0xf] %vm1148_vm1, %v1493_v58  ;;  %v1498_v0 = vpack.c.bf16 %v662_v59, %v662_v59  ;;  %v654_v1 = vadd.f32 %v1865_v34, %v653_v63  ;;  %1182 = vst.msk [vmem:[%s1873_s28 + $0x84] sm:$0xf] %vm1148_vm1, %v1525_v61  ;;  %v1530_v3 = vpack.c.bf16 %v790_v62, %v790_v62 }
  0xe1   : > { %v782_v4 = vadd.f32 %v1865_v34, %v781_v2  ;;  %v1601_v5 = vpop.f32.mrf.mxu0  ;;  %v1633_v8 = vpop.f32.mrf.mxu1 }
  0xe2   : > { %1155 = vst.msk [vmem:[%s1873_s28 + $0x18] sm:$0xf] %vm1148_vm1, %v1498_v0  ;;  %v1496_v6 = vpack.c.bf16 %v654_v1, %v654_v1  ;;  %v665_v7 = vadd.f32 %v1601_v5, %v1865_v34  ;;  %1187 = vst.msk [vmem:[%s1873_s28 + $0x98] sm:$0xf] %vm1148_vm1, %v1530_v3  ;;  %v793_v10 = vadd.f32 %v1633_v8, %v1865_v34 }
  0xe3   : > { %v1528_v9 = vpack.c.bf16 %v782_v4, %v782_v4  ;;  %v656_v11 = vpop.f32.mrf.mxu0  ;;  %v784_v14 = vpop.f32.mrf.mxu1 }
  0xe4   : > { %1153 = vst.msk [vmem:[%s1873_s28 + $0x10] sm:$0xf] %vm1148_vm1, %v1496_v6  ;;  %v1499_v12 = vpack.c.bf16 %v665_v7, %v665_v7  ;;  %v657_v13 = vadd.f32 %v1865_v34, %v656_v11  ;;  %v1531_v15 = vpack.c.bf16 %v793_v10, %v793_v10  ;;  %v785_v16 = vadd.f32 %v1865_v34, %v784_v14 }
  0xe5   : > { %1185 = vst.msk [vmem:[%s1873_s28 + $0x90] sm:$0xf] %vm1148_vm1, %v1528_v9  ;;  %v1604_v17 = vpop.f32.mrf.mxu0  ;;  %v1636_v20 = vpop.f32.mrf.mxu1 }
  0xe6   : > { %1156 = vst.msk [vmem:[%s1873_s28 + $0x1c] sm:$0xf] %vm1148_vm1, %v1499_v12  ;;  %v1497_v18 = vpack.c.bf16 %v657_v13, %v657_v13  ;;  %v678_v19 = vadd.f32 %v1604_v17, %v1865_v34  ;;  %1188 = vst.msk [vmem:[%s1873_s28 + $0x9c] sm:$0xf] %vm1148_vm1, %v1531_v15  ;;  %v1529_v21 = vpack.c.bf16 %v785_v16, %v785_v16 }
  0xe7   : > { %v806_v22 = vadd.f32 %v1636_v20, %v1865_v34  ;;  %v669_v23 = vpop.f32.mrf.mxu0  ;;  %v797_v26 = vpop.f32.mrf.mxu1 }
  0xe8   : > { %1154 = vst.msk [vmem:[%s1873_s28 + $0x14] sm:$0xf] %vm1148_vm1, %v1497_v18  ;;  %v1502_v24 = vpack.c.bf16 %v678_v19, %v678_v19  ;;  %v670_v25 = vadd.f32 %v1865_v34, %v669_v23  ;;  %1186 = vst.msk [vmem:[%s1873_s28 + $0x94] sm:$0xf] %vm1148_vm1, %v1529_v21  ;;  %v798_v28 = vadd.f32 %v1865_v34, %v797_v26 }
  0xe9   : > { %v1534_v27 = vpack.c.bf16 %v806_v22, %v806_v22  ;;  %v1605_v29 = vpop.f32.mrf.mxu0  ;;  %v1637_v32 = vpop.f32.mrf.mxu1 }
  0xea   : > { %1159 = vst.msk [vmem:[%s1873_s28 + $0x28] sm:$0xf] %vm1148_vm1, %v1502_v24  ;;  %v1500_v30 = vpack.c.bf16 %v670_v25, %v670_v25  ;;  %v681_v31 = vadd.f32 %v1605_v29, %v1865_v34  ;;  %v1532_v33 = vpack.c.bf16 %v798_v28, %v798_v28  ;;  %v809_v35 = vadd.f32 %v1637_v32, %v1865_v34 }
  0xeb   : > { %1191 = vst.msk [vmem:[%s1873_s28 + $0xa8] sm:$0xf] %vm1148_vm1, %v1534_v27  ;;  %v672_v36 = vpop.f32.mrf.mxu0  ;;  %v800_v39 = vpop.f32.mrf.mxu1 }
  0xec   : > { %1157 = vst.msk [vmem:[%s1873_s28 + $0x20] sm:$0xf] %vm1148_vm1, %v1500_v30  ;;  %v1503_v37 = vpack.c.bf16 %v681_v31, %v681_v31  ;;  %v673_v38 = vadd.f32 %v1865_v34, %v672_v36  ;;  %1189 = vst.msk [vmem:[%s1873_s28 + $0xa0] sm:$0xf] %vm1148_vm1, %v1532_v33  ;;  %v1535_v40 = vpack.c.bf16 %v809_v35, %v809_v35 }
  0xed   : > { %v801_v41 = vadd.f32 %v1865_v34, %v800_v39  ;;  %v1608_v42 = vpop.f32.mrf.mxu0  ;;  %v1640_v45 = vpop.f32.mrf.mxu1 }
  0xee   : > { %1160 = vst.msk [vmem:[%s1873_s28 + $0x2c] sm:$0xf] %vm1148_vm1, %v1503_v37  ;;  %v1501_v43 = vpack.c.bf16 %v673_v38, %v673_v38  ;;  %v694_v44 = vadd.f32 %v1608_v42, %v1865_v34  ;;  %1192 = vst.msk [vmem:[%s1873_s28 + $0xac] sm:$0xf] %vm1148_vm1, %v1535_v40  ;;  %v822_v47 = vadd.f32 %v1640_v45, %v1865_v34 }
  0xef   : > { %v1533_v46 = vpack.c.bf16 %v801_v41, %v801_v41  ;;  %v685_v48 = vpop.f32.mrf.mxu0  ;;  %v813_v51 = vpop.f32.mrf.mxu1 }
  0xf0   : > { %1158 = vst.msk [vmem:[%s1873_s28 + $0x24] sm:$0xf] %vm1148_vm1, %v1501_v43  ;;  %v1506_v49 = vpack.c.bf16 %v694_v44, %v694_v44  ;;  %v686_v50 = vadd.f32 %v1865_v34, %v685_v48  ;;  %v1538_v52 = vpack.c.bf16 %v822_v47, %v822_v47  ;;  %v814_v53 = vadd.f32 %v1865_v34, %v813_v51 }
  0xf1   : > { %1190 = vst.msk [vmem:[%s1873_s28 + $0xa4] sm:$0xf] %vm1148_vm1, %v1533_v46  ;;  %v1609_v54 = vpop.f32.mrf.mxu0  ;;  %v1641_v57 = vpop.f32.mrf.mxu1 }
  0xf2   : > { %1163 = vst.msk [vmem:[%s1873_s28 + $0x38] sm:$0xf] %vm1148_vm1, %v1506_v49  ;;  %v1504_v55 = vpack.c.bf16 %v686_v50, %v686_v50  ;;  %v697_v56 = vadd.f32 %v1609_v54, %v1865_v34  ;;  %1195 = vst.msk [vmem:[%s1873_s28 + $0xb8] sm:$0xf] %vm1148_vm1, %v1538_v52  ;;  %v1536_v58 = vpack.c.bf16 %v814_v53, %v814_v53 }
  0xf3   : > { %v825_v59 = vadd.f32 %v1641_v57, %v1865_v34  ;;  %v688_v60 = vpop.f32.mrf.mxu0  ;;  %v816_v63 = vpop.f32.mrf.mxu1 }
  0xf4   : > { %1161 = vst.msk [vmem:[%s1873_s28 + $0x30] sm:$0xf] %vm1148_vm1, %v1504_v55  ;;  %v1507_v61 = vpack.c.bf16 %v697_v56, %v697_v56  ;;  %v689_v62 = vadd.f32 %v1865_v34, %v688_v60  ;;  %1193 = vst.msk [vmem:[%s1873_s28 + $0xb0] sm:$0xf] %vm1148_vm1, %v1536_v58  ;;  %v817_v1 = vadd.f32 %v1865_v34, %v816_v63 }
  0xf5   : > { %v1539_v0 = vpack.c.bf16 %v825_v59, %v825_v59  ;;  %v1612_v2 = vpop.f32.mrf.mxu0  ;;  %v1644_v5 = vpop.f32.mrf.mxu1 }
  0xf6   : > { %1164 = vst.msk [vmem:[%s1873_s28 + $0x3c] sm:$0xf] %vm1148_vm1, %v1507_v61  ;;  %v1505_v3 = vpack.c.bf16 %v689_v62, %v689_v62  ;;  %v710_v4 = vadd.f32 %v1612_v2, %v1865_v34  ;;  %v1537_v6 = vpack.c.bf16 %v817_v1, %v817_v1  ;;  %v838_v7 = vadd.f32 %v1644_v5, %v1865_v34 }
  0xf7   : > { %1196 = vst.msk [vmem:[%s1873_s28 + $0xbc] sm:$0xf] %vm1148_vm1, %v1539_v0  ;;  %v701_v8 = vpop.f32.mrf.mxu0  ;;  %v829_v11 = vpop.f32.mrf.mxu1 }
  0xf8   : > { %1162 = vst.msk [vmem:[%s1873_s28 + $0x34] sm:$0xf] %vm1148_vm1, %v1505_v3  ;;  %v1510_v9 = vpack.c.bf16 %v710_v4, %v710_v4  ;;  %v702_v10 = vadd.f32 %v1865_v34, %v701_v8  ;;  %1194 = vst.msk [vmem:[%s1873_s28 + $0xb4] sm:$0xf] %vm1148_vm1, %v1537_v6  ;;  %v1542_v12 = vpack.c.bf16 %v838_v7, %v838_v7 }
  0xf9   : > { %v830_v13 = vadd.f32 %v1865_v34, %v829_v11  ;;  %v1613_v14 = vpop.f32.mrf.mxu0  ;;  %v1645_v17 = vpop.f32.mrf.mxu1 }
  0xfa   : > { %1167 = vst.msk [vmem:[%s1873_s28 + $0x48] sm:$0xf] %vm1148_vm1, %v1510_v9  ;;  %v1508_v15 = vpack.c.bf16 %v702_v10, %v702_v10  ;;  %v713_v16 = vadd.f32 %v1613_v14, %v1865_v34  ;;  %1199 = vst.msk [vmem:[%s1873_s28 + $0xc8] sm:$0xf] %vm1148_vm1, %v1542_v12  ;;  %v841_v19 = vadd.f32 %v1645_v17, %v1865_v34 }
  0xfb   : > { %v1540_v18 = vpack.c.bf16 %v830_v13, %v830_v13  ;;  %v704_v20 = vpop.f32.mrf.mxu0  ;;  %v832_v23 = vpop.f32.mrf.mxu1 }
  0xfc   : > { %1165 = vst.msk [vmem:[%s1873_s28 + $0x40] sm:$0xf] %vm1148_vm1, %v1508_v15  ;;  %v1511_v21 = vpack.c.bf16 %v713_v16, %v713_v16  ;;  %v705_v22 = vadd.f32 %v1865_v34, %v704_v20  ;;  %v1543_v24 = vpack.c.bf16 %v841_v19, %v841_v19  ;;  %v833_v25 = vadd.f32 %v1865_v34, %v832_v23 }
  0xfd   : > { %1197 = vst.msk [vmem:[%s1873_s28 + $0xc0] sm:$0xf] %vm1148_vm1, %v1540_v18  ;;  %v1616_v26 = vpop.f32.mrf.mxu0  ;;  %v1648_v29 = vpop.f32.mrf.mxu1 }
  0xfe   : > { %1168 = vst.msk [vmem:[%s1873_s28 + $0x4c] sm:$0xf] %vm1148_vm1, %v1511_v21  ;;  %v1509_v27 = vpack.c.bf16 %v705_v22, %v705_v22  ;;  %v726_v28 = vadd.f32 %v1616_v26, %v1865_v34  ;;  %1200 = vst.msk [vmem:[%s1873_s28 + $0xcc] sm:$0xf] %vm1148_vm1, %v1543_v24  ;;  %v1541_v30 = vpack.c.bf16 %v833_v25, %v833_v25 }
  0xff   : > { %v854_v31 = vadd.f32 %v1648_v29, %v1865_v34  ;;  %v717_v32 = vpop.f32.mrf.mxu0  ;;  %v845_v36 = vpop.f32.mrf.mxu1 }
 0x100   : > { %1166 = vst.msk [vmem:[%s1873_s28 + $0x44] sm:$0xf] %vm1148_vm1, %v1509_v27  ;;  %v1514_v33 = vpack.c.bf16 %v726_v28, %v726_v28  ;;  %v718_v35 = vadd.f32 %v1865_v34, %v717_v32  ;;  %1198 = vst.msk [vmem:[%s1873_s28 + $0xc4] sm:$0xf] %vm1148_vm1, %v1541_v30  ;;  %v846_v38 = vadd.f32 %v1865_v34, %v845_v36 }
 0x101   : > { %v1546_v37 = vpack.c.bf16 %v854_v31, %v854_v31  ;;  %v1617_v39 = vpop.f32.mrf.mxu0  ;;  %v1649_v42 = vpop.f32.mrf.mxu1 }
 0x102   : > { %1171 = vst.msk [vmem:[%s1873_s28 + $0x58] sm:$0xf] %vm1148_vm1, %v1514_v33  ;;  %v1512_v40 = vpack.c.bf16 %v718_v35, %v718_v35  ;;  %v729_v41 = vadd.f32 %v1617_v39, %v1865_v34  ;;  %v1544_v43 = vpack.c.bf16 %v846_v38, %v846_v38  ;;  %v857_v44 = vadd.f32 %v1649_v42, %v1865_v34 }
 0x103   : > { %1203 = vst.msk [vmem:[%s1873_s28 + $0xd8] sm:$0xf] %vm1148_vm1, %v1546_v37  ;;  %v720_v45 = vpop.f32.mrf.mxu0  ;;  %v848_v48 = vpop.f32.mrf.mxu1 }
 0x104   : > { %1169 = vst.msk [vmem:[%s1873_s28 + $0x50] sm:$0xf] %vm1148_vm1, %v1512_v40  ;;  %v1515_v46 = vpack.c.bf16 %v729_v41, %v729_v41  ;;  %v721_v47 = vadd.f32 %v1865_v34, %v720_v45  ;;  %1201 = vst.msk [vmem:[%s1873_s28 + $0xd0] sm:$0xf] %vm1148_vm1, %v1544_v43  ;;  %v1547_v49 = vpack.c.bf16 %v857_v44, %v857_v44 }
 0x105   : > { %v849_v50 = vadd.f32 %v1865_v34, %v848_v48  ;;  %v1620_v51 = vpop.f32.mrf.mxu0  ;;  %v1652_v54 = vpop.f32.mrf.mxu1 }
 0x106   : > { %1172 = vst.msk [vmem:[%s1873_s28 + $0x5c] sm:$0xf] %vm1148_vm1, %v1515_v46  ;;  %v1513_v52 = vpack.c.bf16 %v721_v47, %v721_v47  ;;  %v742_v53 = vadd.f32 %v1620_v51, %v1865_v34  ;;  %1204 = vst.msk [vmem:[%s1873_s28 + $0xdc] sm:$0xf] %vm1148_vm1, %v1547_v49  ;;  %v870_v56 = vadd.f32 %v1652_v54, %v1865_v34 }
 0x107   : > { %v1545_v55 = vpack.c.bf16 %v849_v50, %v849_v50  ;;  %v733_v57 = vpop.f32.mrf.mxu0  ;;  %v861_v60 = vpop.f32.mrf.mxu1 }
 0x108   : > { %1170 = vst.msk [vmem:[%s1873_s28 + $0x54] sm:$0xf] %vm1148_vm1, %v1513_v52  ;;  %v1518_v58 = vpack.c.bf16 %v742_v53, %v742_v53  ;;  %v734_v59 = vadd.f32 %v1865_v34, %v733_v57  ;;  %v1550_v61 = vpack.c.bf16 %v870_v56, %v870_v56  ;;  %v862_v62 = vadd.f32 %v1865_v34, %v861_v60 }
 0x109   : > { %1202 = vst.msk [vmem:[%s1873_s28 + $0xd4] sm:$0xf] %vm1148_vm1, %v1545_v55  ;;  %v1621_v63 = vpop.f32.mrf.mxu0  ;;  %v1653_v2 = vpop.f32.mrf.mxu1 }
 0x10a   : > { %1175 = vst.msk [vmem:[%s1873_s28 + $0x68] sm:$0xf] %vm1148_vm1, %v1518_v58  ;;  %v1516_v0 = vpack.c.bf16 %v734_v59, %v734_v59  ;;  %v745_v1 = vadd.f32 %v1621_v63, %v1865_v34  ;;  %1207 = vst.msk [vmem:[%s1873_s28 + $0xe8] sm:$0xf] %vm1148_vm1, %v1550_v61  ;;  %v1548_v3 = vpack.c.bf16 %v862_v62, %v862_v62 }
 0x10b   : > { %v873_v4 = vadd.f32 %v1653_v2, %v1865_v34  ;;  %v736_v5 = vpop.f32.mrf.mxu0  ;;  %v864_v8 = vpop.f32.mrf.mxu1 }
 0x10c   : > { %1173 = vst.msk [vmem:[%s1873_s28 + $0x60] sm:$0xf] %vm1148_vm1, %v1516_v0  ;;  %v1519_v6 = vpack.c.bf16 %v745_v1, %v745_v1  ;;  %v737_v7 = vadd.f32 %v1865_v34, %v736_v5  ;;  %1205 = vst.msk [vmem:[%s1873_s28 + $0xe0] sm:$0xf] %vm1148_vm1, %v1548_v3  ;;  %v865_v10 = vadd.f32 %v1865_v34, %v864_v8 }
 0x10d   : > { %v1551_v9 = vpack.c.bf16 %v873_v4, %v873_v4  ;;  %v1624_v11 = vpop.f32.mrf.mxu0  ;;  %v1656_v14 = vpop.f32.mrf.mxu1 }
 0x10e   : > { %1176 = vst.msk [vmem:[%s1873_s28 + $0x6c] sm:$0xf] %vm1148_vm1, %v1519_v6  ;;  %v1517_v12 = vpack.c.bf16 %v737_v7, %v737_v7  ;;  %v758_v13 = vadd.f32 %v1624_v11, %v1865_v34  ;;  %v1549_v15 = vpack.c.bf16 %v865_v10, %v865_v10  ;;  %v886_v16 = vadd.f32 %v1656_v14, %v1865_v34 }
 0x10f   : > { %1208 = vst.msk [vmem:[%s1873_s28 + $0xec] sm:$0xf] %vm1148_vm1, %v1551_v9  ;;  %v749_v17 = vpop.f32.mrf.mxu0  ;;  %v877_v20 = vpop.f32.mrf.mxu1 }
 0x110   : > { %1174 = vst.msk [vmem:[%s1873_s28 + $0x64] sm:$0xf] %vm1148_vm1, %v1517_v12  ;;  %v1522_v18 = vpack.c.bf16 %v758_v13, %v758_v13  ;;  %v750_v19 = vadd.f32 %v1865_v34, %v749_v17  ;;  %1206 = vst.msk [vmem:[%s1873_s28 + $0xe4] sm:$0xf] %vm1148_vm1, %v1549_v15  ;;  %v1554_v21 = vpack.c.bf16 %v886_v16, %v886_v16 }
 0x111   : > { %v878_v22 = vadd.f32 %v1865_v34, %v877_v20  ;;  %v1625_v23 = vpop.f32.mrf.mxu0  ;;  %v1657_v26 = vpop.f32.mrf.mxu1 }
 0x112   : > { %1179 = vst.msk [vmem:[%s1873_s28 + $0x78] sm:$0xf] %vm1148_vm1, %v1522_v18  ;;  %v1520_v24 = vpack.c.bf16 %v750_v19, %v750_v19  ;;  %v761_v25 = vadd.f32 %v1625_v23, %v1865_v34  ;;  %1211 = vst.msk [vmem:[%s1873_s28 + $0xf8] sm:$0xf] %vm1148_vm1, %v1554_v21  ;;  %v889_v28 = vadd.f32 %v1657_v26, %v1865_v34 }
 0x113   : > { %v1552_v27 = vpack.c.bf16 %v878_v22, %v878_v22  ;;  %v752_v29 = vpop.f32.mrf.mxu0  ;;  %v880_v32 = vpop.f32.mrf.mxu1 }
 0x114   : > { %1177 = vst.msk [vmem:[%s1873_s28 + $0x70] sm:$0xf] %vm1148_vm1, %v1520_v24  ;;  %v1523_v30 = vpack.c.bf16 %v761_v25, %v761_v25  ;;  %v753_v31 = vadd.f32 %v1865_v34, %v752_v29  ;;  %v1555_v33 = vpack.c.bf16 %v889_v28, %v889_v28  ;;  %v881_v35 = vadd.f32 %v1865_v34, %v880_v32 }
 0x115   : > { %1209 = vst.msk [vmem:[%s1873_s28 + $0xf0] sm:$0xf] %vm1148_vm1, %v1552_v27 }
 0x116   : > { %1180 = vst.msk [vmem:[%s1873_s28 + $0x7c] sm:$0xf] %vm1148_vm1, %v1523_v30  ;;  %v1521_v36 = vpack.c.bf16 %v753_v31, %v753_v31  ;;  %1212 = vst.msk [vmem:[%s1873_s28 + $0xfc] sm:$0xf] %vm1148_vm1, %v1555_v33  ;;  %v1553_v37 = vpack.c.bf16 %v881_v35, %v881_v35 }
 0x118   : > { %1178 = vst.msk [vmem:[%s1873_s28 + $0x74] sm:$0xf] %vm1148_vm1, %v1521_v36  ;;  %1210 = vst.msk [vmem:[%s1873_s28 + $0xf4] sm:$0xf] %vm1148_vm1, %v1553_v37 }
 0x119 PF: > { %s13_s14 = sadd.s32 1, %s1742_s14   ;;  %s2079_s12 = smov %s1738_s13 }
 0x11a   : > { %p10_p5 = scmp.ge.s32.totalorder %s13_s14, 4   ;;  %s2080_s13 = smov %s2082_s15 }
 0x11c   :  { %12 = sbr.rel (!%p10_p5) target bundleno = 2 (0x2), region = 68 }

</bundles_post_ra>
